<compile_context>
chip_gen: v5e
topology: v5e:2x2
jax: 0.10.0
libtpu: 0.0.40
codegen_flags: <defaults>
</compile_context>

<pallas_src>
import functools

import jax
import jax.numpy as jnp
from jax.experimental import pallas as pl
from jax.experimental.pallas import tpu as pltpu

LANE = 128      # TPU lane width (last-dim tiling unit)
SUBLANE = 8     # f32 sublane width (second-to-last-dim tiling unit)


def _round_up(n: int, m: int) -> int:
    return ((n + m - 1) // m) * m


def _mlp_kernel(x_ref, w0_ref, b0_ref, wh_ref, bh_ref, wo_ref, bo_ref, out_ref,
                *, n_layers: int, compute_dtype):
    # x_ref:  (TM, Xp)                       compute_dtype
    # w0_ref: (Xp, Hp)                       compute_dtype
    # b0_ref: (1, Hp)                        f32
    # wh_ref: (n_layers, Hp, Hp)             compute_dtype
    # bh_ref: (n_layers, 1, Hp)              f32
    # wo_ref: (Hp, Yp)                       compute_dtype
    # bo_ref: (1, Yp)                        f32
    # out_ref: (TM, Yp)
    h = jnp.dot(x_ref[...], w0_ref[...], preferred_element_type=jnp.float32)
    h = jnp.maximum(h + b0_ref[...], 0.0)

    # Hidden layers (n_layers is static -> unrolled at trace time).
    for layer in range(n_layers):
        h = jnp.dot(h.astype(compute_dtype), wh_ref[layer],
                    preferred_element_type=jnp.float32)
        h = jnp.maximum(h + bh_ref[layer], 0.0)

    # Output layer (no activation).
    y = jnp.dot(h.astype(compute_dtype), wo_ref[...],
                preferred_element_type=jnp.float32)
    y = y + bo_ref[...]
    out_ref[...] = y.astype(out_ref.dtype)


def generator_forward(x, params, *, n_layers: int, tile_m: int = 128,
                      compute_dtype=jnp.float32):
    """Runs the Generator MLP forward pass with a fused Pallas TPU kernel."""
    w0, b0, wh, bh, wo, bo = params
    B, x_dim = x.shape
    hidden = w0.shape[1]
    y_dim = wo.shape[1]
    out_dtype = x.dtype
    cdt = compute_dtype

    # ---- lane-pad feature dims to 128 (full vregs, unmasked stores, full MXU).
    xp = _round_up(x_dim, LANE)
    hp = _round_up(hidden, LANE)
    yp = _round_up(y_dim, LANE)

    w0p = jnp.zeros((xp, hp), cdt).at[:x_dim, :hidden].set(w0.astype(cdt))
    b0p = jnp.zeros((1, hp), jnp.float32).at[0, :hidden].set(b0)
    whp = jnp.zeros((n_layers, hp, hp), cdt).at[:, :hidden, :hidden].set(
        wh.astype(cdt))
    bhp = jnp.zeros((n_layers, 1, hp), jnp.float32).at[:, 0, :hidden].set(bh)
    wop = jnp.zeros((hp, yp), cdt).at[:hidden, :y_dim].set(wo.astype(cdt))
    bop = jnp.zeros((1, yp), jnp.float32).at[0, :y_dim].set(bo)

    # ---- batch tiling: one block if the batch fits, else tile_m-row tiles.
    if B <= tile_m:
        tm = _round_up(B, SUBLANE)        # whole batch in one grid step
    else:
        tm = tile_m                        # 128+ rows per step (fills MXU M dim)
    B_pad = _round_up(B, tm)
    grid = (B_pad // tm,)
    # NOTE(v7x): with >= 2 grid steps and "parallel" semantics both TensorCores
    # split the batch; a single-block batch uses one TC (pick tile_m <= B/2).

    x_p = jnp.zeros((B_pad, xp), cdt).at[:B, :x_dim].set(x.astype(cdt))

    kernel = functools.partial(_mlp_kernel, n_layers=n_layers,
                               compute_dtype=cdt)

    w_bytes = jnp.dtype(cdt).itemsize
    flops = 2 * B_pad * (xp * hp + n_layers * hp * hp + hp * yp)
    bytes_accessed = (
        x_p.size * w_bytes
        + (w0p.size + whp.size + wop.size) * w_bytes
        + (b0p.size + bhp.size + bop.size) * 4
        + B_pad * yp * jnp.dtype(out_dtype).itemsize)
    cost = pl.CostEstimate(flops=flops, transcendentals=0,
                           bytes_accessed=bytes_accessed)

    def _resident_spec(shape, pipeline_mode):
        ndim = len(shape)
        index_map = lambda i, _n=ndim: (0,) * _n
        if pipeline_mode is None:
            return pl.BlockSpec(shape, index_map)
        return pl.BlockSpec(shape, index_map, pipeline_mode=pipeline_mode)

    def _run(weight_pipeline_mode):
        call = pl.pallas_call(
            kernel,
            out_shape=jax.ShapeDtypeStruct((B_pad, yp), out_dtype),
            grid_spec=pltpu.PrefetchScalarGridSpec(
                num_scalar_prefetch=0,
                grid=grid,
                in_specs=[
                    # activations: tiled over the batch
                    pl.BlockSpec((tm, xp), lambda i: (i, 0)),
                    # weights / biases: grid-invariant, resident in VMEM
                    _resident_spec((xp, hp), weight_pipeline_mode),
                    _resident_spec((1, hp), weight_pipeline_mode),
                    _resident_spec((n_layers, hp, hp), weight_pipeline_mode),
                    _resident_spec((n_layers, 1, hp), weight_pipeline_mode),
                    _resident_spec((hp, yp), weight_pipeline_mode),
                    _resident_spec((1, yp), weight_pipeline_mode),
                ],
                out_specs=pl.BlockSpec((tm, yp), lambda i: (i, 0)),
            ),
            compiler_params=pltpu.CompilerParams(
                dimension_semantics=("parallel",)),
            cost_estimate=cost,
        )
        out = call(x_p, w0p, b0p, whp, bhp, wop, bop)
        return jax.block_until_ready(out)

    # Weights are grid-invariant: request single-buffering so Pallas does not
    # allocate a second (dead) VMEM copy of every weight tensor.  Fall back to
    # default double-buffering if this jax version rejects Buffered(1).
    try:
        out_p = _run(pl.Buffered(1))
    except Exception:
        out_p = _run(None)

    # TODO(synk): for large hidden on v7x (64 MiB VMEM), keep `wh` in HBM
    # (memory_space=pl.ANY) and stream one (Hp, Hp) layer tile at a time with
    # pltpu.emit_pipeline / manual double-buffering instead of keeping all
    # layers resident.
    return out_p[:B, :y_dim]


def init_params(key, x_dim, hidden_dim, y_dim, n_layers):
    """Deterministic synthetic parameter init (weights stored as (in, out))."""
    ks = jax.random.split(key, 6)
    s_in = 1.0 / jnp.sqrt(x_dim)
    s_h = 1.0 / jnp.sqrt(hidden_dim)
    w0 = jax.random.uniform(ks[0], (x_dim, hidden_dim), jnp.float32, -s_in, s_in)
    b0 = jax.random.uniform(ks[1], (hidden_dim,), jnp.float32, -s_in, s_in)
    wh = jax.random.uniform(ks[2], (n_layers, hidden_dim, hidden_dim),
                            jnp.float32, -s_h, s_h)
    bh = jax.random.uniform(ks[3], (n_layers, hidden_dim), jnp.float32,
                            -s_h, s_h)
    wo = jax.random.uniform(ks[4], (hidden_dim, y_dim), jnp.float32, -s_h, s_h)
    bo = jax.random.uniform(ks[5], (y_dim,), jnp.float32, -s_h, s_h)
    return (w0, b0, wh, bh, wo, bo)


def reference_forward(x, params, n_layers):
    """Pure-JAX reference of the same MLP for a correctness check."""
    w0, b0, wh, bh, wo, bo = params
    h = jnp.maximum(x @ w0 + b0[None, :], 0.0)
    for layer in range(n_layers):
        h = jnp.maximum(h @ wh[layer] + bh[layer][None, :], 0.0)
    return h @ wo + bo[None, :]


if __name__ == "__main__":
    # Small shapes consistent with the module: Generator(x_dim=16, hidden_dim=32,
    # y_dim=8, n_layers=3), batch=16.
    x_dim, hidden_dim, y_dim, n_layers = 16, 32, 8, 3
    batch = 16

    key = jax.random.PRNGKey(0)
    kx, kp = jax.random.split(key)
    x = jax.random.normal(kx, (batch, x_dim), jnp.float32)
    params = init_params(kp, x_dim, hidden_dim, y_dim, n_layers)
    ref = reference_forward(x, params, n_layers)

    # f32 compute path (v5e-friendly): must match the reference tightly.
    out_f32 = generator_forward(x, params, n_layers=n_layers,
                                compute_dtype=jnp.float32)
    out_f32 = jax.block_until_ready(out_f32)
    assert out_f32.shape == (batch, y_dim)
    assert jnp.allclose(out_f32, ref, atol=1e-5, rtol=1e-5), "f32 mismatch"

    # bf16 compute path (v6e/v7x lever): looser tolerance for bf16 rounding.
    out_bf16 = generator_forward(x, params, n_layers=n_layers,
                                 compute_dtype=jnp.bfloat16)
    out_bf16 = jax.block_until_ready(out_bf16)
    assert out_bf16.shape == (batch, y_dim)
    assert jnp.allclose(out_bf16, ref, atol=5e-2, rtol=5e-2), "bf16 mismatch"

    print("KERNEL_OK")
</pallas_src>

<mosaic_0001>
module attributes {stable_mosaic.version = 11 : i64} {
  func.func @_mlp_kernel(%arg0: i32, %arg1: memref<16x128xf32, #tpu.memory_space<vmem>>, %arg2: memref<128x128xf32, #tpu.memory_space<vmem>>, %arg3: memref<1x128xf32, #tpu.memory_space<vmem>>, %arg4: memref<3x128x128xf32, #tpu.memory_space<vmem>>, %arg5: memref<3x1x128xf32, #tpu.memory_space<vmem>>, %arg6: memref<128x128xf32, #tpu.memory_space<vmem>>, %arg7: memref<1x128xf32, #tpu.memory_space<vmem>>, %arg8: memref<16x128xf32, #tpu.memory_space<vmem>>) attributes {dimension_semantics = [#tpu.dimension_semantics<parallel>], iteration_bounds = array<i64: 1>, scalar_prefetch = 0 : i64, scratch_operands = 0 : i64, tpu.core_type = #tpu.core_type<tc>, window_params = [{transform_indices = @transform_0, window_bounds = array<i64: 16, 128>}, {pipeline_mode = #tpu.pipeline_mode<synchronous>, transform_indices = @transform_1, window_bounds = array<i64: 128, 128>}, {pipeline_mode = #tpu.pipeline_mode<synchronous>, transform_indices = @transform_2, window_bounds = array<i64: 1, 128>}, {pipeline_mode = #tpu.pipeline_mode<synchronous>, transform_indices = @transform_3, window_bounds = array<i64: 3, 128, 128>}, {pipeline_mode = #tpu.pipeline_mode<synchronous>, transform_indices = @transform_4, window_bounds = array<i64: 3, 1, 128>}, {pipeline_mode = #tpu.pipeline_mode<synchronous>, transform_indices = @transform_5, window_bounds = array<i64: 128, 128>}, {pipeline_mode = #tpu.pipeline_mode<synchronous>, transform_indices = @transform_6, window_bounds = array<i64: 1, 128>}, {transform_indices = @transform_7, window_bounds = array<i64: 16, 128>}]} {
    %c0 = arith.constant 0 : index
    %c0_0 = arith.constant 0 : index
    %0 = vector.load %arg1[%c0, %c0_0] : memref<16x128xf32, #tpu.memory_space<vmem>>, vector<16x128xf32>
    %c0_1 = arith.constant 0 : index
    %c0_2 = arith.constant 0 : index
    %1 = vector.load %arg2[%c0_1, %c0_2] : memref<128x128xf32, #tpu.memory_space<vmem>>, vector<128x128xf32>
    %cst = arith.constant dense<0.000000e+00> : vector<16x128xf32>
    %2 = tpu.matmul %0, %1, %cst {dimension_numbers = #tpu.dot_dimension_numbers<[1], [0], [0], [1], [0, 0, 1, 1], [], []>} : vector<16x128xf32>, vector<128x128xf32>, vector<16x128xf32> -> vector<16x128xf32>
    %c0_3 = arith.constant 0 : index
    %c0_4 = arith.constant 0 : index
    %3 = vector.load %arg3[%c0_3, %c0_4] : memref<1x128xf32, #tpu.memory_space<vmem>>, vector<1x128xf32>
    %4 = vector.broadcast %3 : vector<1x128xf32> to vector<16x128xf32>
    %5 = arith.addf %2, %4 : vector<16x128xf32>
    %cst_5 = arith.constant 0.000000e+00 : f32
    %6 = vector.broadcast %cst_5 : f32 to vector<16x128xf32>
    %7 = arith.maximumf %5, %6 : vector<16x128xf32>
    %c0_6 = arith.constant 0 : index
    %c0_7 = arith.constant 0 : index
    %c0_8 = arith.constant 0 : index
    %8 = vector.load %arg4[%c0_6, %c0_7, %c0_8] : memref<3x128x128xf32, #tpu.memory_space<vmem>>, vector<1x128x128xf32>
    %9 = vector.shape_cast %8 : vector<1x128x128xf32> to vector<128x128xf32>
    %cst_9 = arith.constant dense<0.000000e+00> : vector<16x128xf32>
    %10 = tpu.matmul %7, %9, %cst_9 {dimension_numbers = #tpu.dot_dimension_numbers<[1], [0], [0], [1], [0, 0, 1, 1], [], []>} : vector<16x128xf32>, vector<128x128xf32>, vector<16x128xf32> -> vector<16x128xf32>
    %c0_10 = arith.constant 0 : index
    %c0_11 = arith.constant 0 : index
    %c0_12 = arith.constant 0 : index
    %11 = vector.load %arg5[%c0_10, %c0_11, %c0_12] : memref<3x1x128xf32, #tpu.memory_space<vmem>>, vector<1x1x128xf32>
    %12 = vector.shape_cast %11 : vector<1x1x128xf32> to vector<1x128xf32>
    %13 = vector.broadcast %12 : vector<1x128xf32> to vector<16x128xf32>
    %14 = arith.addf %10, %13 : vector<16x128xf32>
    %cst_13 = arith.constant 0.000000e+00 : f32
    %15 = vector.broadcast %cst_13 : f32 to vector<16x128xf32>
    %16 = arith.maximumf %14, %15 : vector<16x128xf32>
    %c1 = arith.constant 1 : index
    %c0_14 = arith.constant 0 : index
    %c0_15 = arith.constant 0 : index
    %17 = vector.load %arg4[%c1, %c0_14, %c0_15] : memref<3x128x128xf32, #tpu.memory_space<vmem>>, vector<1x128x128xf32>
    %18 = vector.shape_cast %17 : vector<1x128x128xf32> to vector<128x128xf32>
    %cst_16 = arith.constant dense<0.000000e+00> : vector<16x128xf32>
    %19 = tpu.matmul %16, %18, %cst_16 {dimension_numbers = #tpu.dot_dimension_numbers<[1], [0], [0], [1], [0, 0, 1, 1], [], []>} : vector<16x128xf32>, vector<128x128xf32>, vector<16x128xf32> -> vector<16x128xf32>
    %c1_17 = arith.constant 1 : index
    %c0_18 = arith.constant 0 : index
    %c0_19 = arith.constant 0 : index
    %20 = vector.load %arg5[%c1_17, %c0_18, %c0_19] : memref<3x1x128xf32, #tpu.memory_space<vmem>>, vector<1x1x128xf32>
    %21 = vector.shape_cast %20 : vector<1x1x128xf32> to vector<1x128xf32>
    %22 = vector.broadcast %21 : vector<1x128xf32> to vector<16x128xf32>
    %23 = arith.addf %19, %22 : vector<16x128xf32>
    %cst_20 = arith.constant 0.000000e+00 : f32
    %24 = vector.broadcast %cst_20 : f32 to vector<16x128xf32>
    %25 = arith.maximumf %23, %24 : vector<16x128xf32>
    %c2 = arith.constant 2 : index
    %c0_21 = arith.constant 0 : index
    %c0_22 = arith.constant 0 : index
    %26 = vector.load %arg4[%c2, %c0_21, %c0_22] : memref<3x128x128xf32, #tpu.memory_space<vmem>>, vector<1x128x128xf32>
    %27 = vector.shape_cast %26 : vector<1x128x128xf32> to vector<128x128xf32>
    %cst_23 = arith.constant dense<0.000000e+00> : vector<16x128xf32>
    %28 = tpu.matmul %25, %27, %cst_23 {dimension_numbers = #tpu.dot_dimension_numbers<[1], [0], [0], [1], [0, 0, 1, 1], [], []>} : vector<16x128xf32>, vector<128x128xf32>, vector<16x128xf32> -> vector<16x128xf32>
    %c2_24 = arith.constant 2 : index
    %c0_25 = arith.constant 0 : index
    %c0_26 = arith.constant 0 : index
    %29 = vector.load %arg5[%c2_24, %c0_25, %c0_26] : memref<3x1x128xf32, #tpu.memory_space<vmem>>, vector<1x1x128xf32>
    %30 = vector.shape_cast %29 : vector<1x1x128xf32> to vector<1x128xf32>
    %31 = vector.broadcast %30 : vector<1x128xf32> to vector<16x128xf32>
    %32 = arith.addf %28, %31 : vector<16x128xf32>
    %cst_27 = arith.constant 0.000000e+00 : f32
    %33 = vector.broadcast %cst_27 : f32 to vector<16x128xf32>
    %34 = arith.maximumf %32, %33 : vector<16x128xf32>
    %c0_28 = arith.constant 0 : index
    %c0_29 = arith.constant 0 : index
    %35 = vector.load %arg6[%c0_28, %c0_29] : memref<128x128xf32, #tpu.memory_space<vmem>>, vector<128x128xf32>
    %cst_30 = arith.constant dense<0.000000e+00> : vector<16x128xf32>
    %36 = tpu.matmul %34, %35, %cst_30 {dimension_numbers = #tpu.dot_dimension_numbers<[1], [0], [0], [1], [0, 0, 1, 1], [], []>} : vector<16x128xf32>, vector<128x128xf32>, vector<16x128xf32> -> vector<16x128xf32>
    %c0_31 = arith.constant 0 : index
    %c0_32 = arith.constant 0 : index
    %37 = vector.load %arg7[%c0_31, %c0_32] : memref<1x128xf32, #tpu.memory_space<vmem>>, vector<1x128xf32>
    %38 = vector.broadcast %37 : vector<1x128xf32> to vector<16x128xf32>
    %39 = arith.addf %36, %38 : vector<16x128xf32>
    %c0_33 = arith.constant 0 : index
    %c0_34 = arith.constant 0 : index
    %40 = vector.load %arg8[%c0_33, %c0_34] : memref<16x128xf32, #tpu.memory_space<vmem>>, vector<16x128xf32>
    tpu.vector_store %arg8[%c0_33, %c0_34], %39 {strides = array<i32>} : memref<16x128xf32, #tpu.memory_space<vmem>>, vector<16x128xf32>,
    return
  }
  func.func @transform_0(%arg0: i32) -> (i32, i32) {
    %c0_i32 = arith.constant 0 : i32
    %c0_i32_0 = arith.constant 0 : i32
    return %arg0, %c0_i32 : i32, i32
  }
  func.func @transform_1(%arg0: i32) -> (i32, i32) {
    %c0_i32 = arith.constant 0 : i32
    %c0_i32_0 = arith.constant 0 : i32
    %c0_i32_1 = arith.constant 0 : i32
    return %c0_i32, %c0_i32_0 : i32, i32
  }
  func.func @transform_2(%arg0: i32) -> (i32, i32) {
    %c0_i32 = arith.constant 0 : i32
    %c0_i32_0 = arith.constant 0 : i32
    %c0_i32_1 = arith.constant 0 : i32
    return %c0_i32, %c0_i32_0 : i32, i32
  }
  func.func @transform_3(%arg0: i32) -> (i32, i32, i32) {
    %c0_i32 = arith.constant 0 : i32
    %c0_i32_0 = arith.constant 0 : i32
    %c0_i32_1 = arith.constant 0 : i32
    %c0_i32_2 = arith.constant 0 : i32
    return %c0_i32, %c0_i32_0, %c0_i32_1 : i32, i32, i32
  }
  func.func @transform_4(%arg0: i32) -> (i32, i32, i32) {
    %c0_i32 = arith.constant 0 : i32
    %c0_i32_0 = arith.constant 0 : i32
    %c0_i32_1 = arith.constant 0 : i32
    %c0_i32_2 = arith.constant 0 : i32
    return %c0_i32, %c0_i32_0, %c0_i32_1 : i32, i32, i32
  }
  func.func @transform_5(%arg0: i32) -> (i32, i32) {
    %c0_i32 = arith.constant 0 : i32
    %c0_i32_0 = arith.constant 0 : i32
    %c0_i32_1 = arith.constant 0 : i32
    return %c0_i32, %c0_i32_0 : i32, i32
  }
  func.func @transform_6(%arg0: i32) -> (i32, i32) {
    %c0_i32 = arith.constant 0 : i32
    %c0_i32_0 = arith.constant 0 : i32
    %c0_i32_1 = arith.constant 0 : i32
    return %c0_i32, %c0_i32_0 : i32, i32
  }
  func.func @transform_7(%arg0: i32) -> (i32, i32) {
    %c0_i32 = arith.constant 0 : i32
    %c0_i32_0 = arith.constant 0 : i32
    return %arg0, %c0_i32 : i32, i32
  }
}

module attributes {stable_mosaic.version = 11 : i64} {
  func.func @_mlp_kernel(%arg0: i32, %arg1: memref<16x128xf32, #tpu.memory_space<vmem>>, %arg2: memref<128x128xf32, #tpu.memory_space<vmem>>, %arg3: memref<1x128xf32, #tpu.memory_space<vmem>>, %arg4: memref<3x128x128xf32, #tpu.memory_space<vmem>>, %arg5: memref<3x1x128xf32, #tpu.memory_space<vmem>>, %arg6: memref<128x128xf32, #tpu.memory_space<vmem>>, %arg7: memref<1x128xf32, #tpu.memory_space<vmem>>, %arg8: memref<16x128xf32, #tpu.memory_space<vmem>>) attributes {dimension_semantics = [#tpu.dimension_semantics<parallel>], iteration_bounds = array<i64: 1>, scalar_prefetch = 0 : i64, scratch_operands = 0 : i64, tpu.core_type = #tpu.core_type<tc>, window_params = [{transform_indices = @transform_0, window_bounds = array<i64: 16, 128>}, {pipeline_mode = #tpu.pipeline_mode<synchronous>, transform_indices = @transform_1, window_bounds = array<i64: 128, 128>}, {pipeline_mode = #tpu.pipeline_mode<synchronous>, transform_indices = @transform_2, window_bounds = array<i64: 1, 128>}, {pipeline_mode = #tpu.pipeline_mode<synchronous>, transform_indices = @transform_3, window_bounds = array<i64: 3, 128, 128>}, {pipeline_mode = #tpu.pipeline_mode<synchronous>, transform_indices = @transform_4, window_bounds = array<i64: 3, 1, 128>}, {pipeline_mode = #tpu.pipeline_mode<synchronous>, transform_indices = @transform_5, window_bounds = array<i64: 128, 128>}, {pipeline_mode = #tpu.pipeline_mode<synchronous>, transform_indices = @transform_6, window_bounds = array<i64: 1, 128>}, {transform_indices = @transform_7, window_bounds = array<i64: 16, 128>}]} {
    %c0 = arith.constant 0 : index
    %c0_0 = arith.constant 0 : index
    %0 = vector.load %arg1[%c0, %c0_0] : memref<16x128xf32, #tpu.memory_space<vmem>>, vector<16x128xf32>
    %c0_1 = arith.constant 0 : index
    %c0_2 = arith.constant 0 : index
    %1 = vector.load %arg2[%c0_1, %c0_2] : memref<128x128xf32, #tpu.memory_space<vmem>>, vector<128x128xf32>
    %cst = arith.constant dense<0.000000e+00> : vector<16x128xf32>
    %2 = tpu.matmul %0, %1, %cst {dimension_numbers = #tpu.dot_dimension_numbers<[1], [0], [0], [1], [0, 0, 1, 1], [], []>} : vector<16x128xf32>, vector<128x128xf32>, vector<16x128xf32> -> vector<16x128xf32>
    %c0_3 = arith.constant 0 : index
    %c0_4 = arith.constant 0 : index
    %3 = vector.load %arg3[%c0_3, %c0_4] : memref<1x128xf32, #tpu.memory_space<vmem>>, vector<1x128xf32>
    %4 = vector.broadcast %3 : vector<1x128xf32> to vector<16x128xf32>
    %5 = arith.addf %2, %4 : vector<16x128xf32>
    %cst_5 = arith.constant 0.000000e+00 : f32
    %6 = vector.broadcast %cst_5 : f32 to vector<16x128xf32>
    %7 = arith.maximumf %5, %6 : vector<16x128xf32>
    %c0_6 = arith.constant 0 : index
    %c0_7 = arith.constant 0 : index
    %c0_8 = arith.constant 0 : index
    %8 = vector.load %arg4[%c0_6, %c0_7, %c0_8] : memref<3x128x128xf32, #tpu.memory_space<vmem>>, vector<1x128x128xf32>
    %9 = vector.shape_cast %8 : vector<1x128x128xf32> to vector<128x128xf32>
    %cst_9 = arith.constant dense<0.000000e+00> : vector<16x128xf32>
    %10 = tpu.matmul %7, %9, %cst_9 {dimension_numbers = #tpu.dot_dimension_numbers<[1], [0], [0], [1], [0, 0, 1, 1], [], []>} : vector<16x128xf32>, vector<128x128xf32>, vector<16x128xf32> -> vector<16x128xf32>
    %c0_10 = arith.constant 0 : index
    %c0_11 = arith.constant 0 : index
    %c0_12 = arith.constant 0 : index
    %11 = vector.load %arg5[%c0_10, %c0_11, %c0_12] : memref<3x1x128xf32, #tpu.memory_space<vmem>>, vector<1x1x128xf32>
    %12 = vector.shape_cast %11 : vector<1x1x128xf32> to vector<1x128xf32>
    %13 = vector.broadcast %12 : vector<1x128xf32> to vector<16x128xf32>
    %14 = arith.addf %10, %13 : vector<16x128xf32>
    %cst_13 = arith.constant 0.000000e+00 : f32
    %15 = vector.broadcast %cst_13 : f32 to vector<16x128xf32>
    %16 = arith.maximumf %14, %15 : vector<16x128xf32>
    %c1 = arith.constant 1 : index
    %c0_14 = arith.constant 0 : index
    %c0_15 = arith.constant 0 : index
    %17 = vector.load %arg4[%c1, %c0_14, %c0_15] : memref<3x128x128xf32, #tpu.memory_space<vmem>>, vector<1x128x128xf32>
    %18 = vector.shape_cast %17 : vector<1x128x128xf32> to vector<128x128xf32>
    %cst_16 = arith.constant dense<0.000000e+00> : vector<16x128xf32>
    %19 = tpu.matmul %16, %18, %cst_16 {dimension_numbers = #tpu.dot_dimension_numbers<[1], [0], [0], [1], [0, 0, 1, 1], [], []>} : vector<16x128xf32>, vector<128x128xf32>, vector<16x128xf32> -> vector<16x128xf32>
    %c1_17 = arith.constant 1 : index
    %c0_18 = arith.constant 0 : index
    %c0_19 = arith.constant 0 : index
    %20 = vector.load %arg5[%c1_17, %c0_18, %c0_19] : memref<3x1x128xf32, #tpu.memory_space<vmem>>, vector<1x1x128xf32>
    %21 = vector.shape_cast %20 : vector<1x1x128xf32> to vector<1x128xf32>
    %22 = vector.broadcast %21 : vector<1x128xf32> to vector<16x128xf32>
    %23 = arith.addf %19, %22 : vector<16x128xf32>
    %cst_20 = arith.constant 0.000000e+00 : f32
    %24 = vector.broadcast %cst_20 : f32 to vector<16x128xf32>
    %25 = arith.maximumf %23, %24 : vector<16x128xf32>
    %c2 = arith.constant 2 : index
    %c0_21 = arith.constant 0 : index
    %c0_22 = arith.constant 0 : index
    %26 = vector.load %arg4[%c2, %c0_21, %c0_22] : memref<3x128x128xf32, #tpu.memory_space<vmem>>, vector<1x128x128xf32>
    %27 = vector.shape_cast %26 : vector<1x128x128xf32> to vector<128x128xf32>
    %cst_23 = arith.constant dense<0.000000e+00> : vector<16x128xf32>
    %28 = tpu.matmul %25, %27, %cst_23 {dimension_numbers = #tpu.dot_dimension_numbers<[1], [0], [0], [1], [0, 0, 1, 1], [], []>} : vector<16x128xf32>, vector<128x128xf32>, vector<16x128xf32> -> vector<16x128xf32>
    %c2_24 = arith.constant 2 : index
    %c0_25 = arith.constant 0 : index
    %c0_26 = arith.constant 0 : index
    %29 = vector.load %arg5[%c2_24, %c0_25, %c0_26] : memref<3x1x128xf32, #tpu.memory_space<vmem>>, vector<1x1x128xf32>
    %30 = vector.shape_cast %29 : vector<1x1x128xf32> to vector<1x128xf32>
    %31 = vector.broadcast %30 : vector<1x128xf32> to vector<16x128xf32>
    %32 = arith.addf %28, %31 : vector<16x128xf32>
    %cst_27 = arith.constant 0.000000e+00 : f32
    %33 = vector.broadcast %cst_27 : f32 to vector<16x128xf32>
    %34 = arith.maximumf %32, %33 : vector<16x128xf32>
    %c0_28 = arith.constant 0 : index
    %c0_29 = arith.constant 0 : index
    %35 = vector.load %arg6[%c0_28, %c0_29] : memref<128x128xf32, #tpu.memory_space<vmem>>, vector<128x128xf32>
    %cst_30 = arith.constant dense<0.000000e+00> : vector<16x128xf32>
    %36 = tpu.matmul %34, %35, %cst_30 {dimension_numbers = #tpu.dot_dimension_numbers<[1], [0], [0], [1], [0, 0, 1, 1], [], []>} : vector<16x128xf32>, vector<128x128xf32>, vector<16x128xf32> -> vector<16x128xf32>
    %c0_31 = arith.constant 0 : index
    %c0_32 = arith.constant 0 : index
    %37 = vector.load %arg7[%c0_31, %c0_32] : memref<1x128xf32, #tpu.memory_space<vmem>>, vector<1x128xf32>
    %38 = vector.broadcast %37 : vector<1x128xf32> to vector<16x128xf32>
    %39 = arith.addf %36, %38 : vector<16x128xf32>
    %c0_33 = arith.constant 0 : index
    %c0_34 = arith.constant 0 : index
    %40 = vector.load %arg8[%c0_33, %c0_34] : memref<16x128xf32, #tpu.memory_space<vmem>>, vector<16x128xf32>
    tpu.vector_store %arg8[%c0_33, %c0_34], %39 {strides = array<i32>} : memref<16x128xf32, #tpu.memory_space<vmem>>, vector<16x128xf32>,
    return
  }
  func.func @transform_0(%arg0: i32) -> (i32, i32) {
    %c0_i32 = arith.constant 0 : i32
    %c0_i32_0 = arith.constant 0 : i32
    return %arg0, %c0_i32 : i32, i32
  }
  func.func @transform_1(%arg0: i32) -> (i32, i32) {
    %c0_i32 = arith.constant 0 : i32
    %c0_i32_0 = arith.constant 0 : i32
    %c0_i32_1 = arith.constant 0 : i32
    return %c0_i32, %c0_i32_0 : i32, i32
  }
  func.func @transform_2(%arg0: i32) -> (i32, i32) {
    %c0_i32 = arith.constant 0 : i32
    %c0_i32_0 = arith.constant 0 : i32
    %c0_i32_1 = arith.constant 0 : i32
    return %c0_i32, %c0_i32_0 : i32, i32
  }
  func.func @transform_3(%arg0: i32) -> (i32, i32, i32) {
    %c0_i32 = arith.constant 0 : i32
    %c0_i32_0 = arith.constant 0 : i32
    %c0_i32_1 = arith.constant 0 : i32
    %c0_i32_2 = arith.constant 0 : i32
    return %c0_i32, %c0_i32_0, %c0_i32_1 : i32, i32, i32
  }
  func.func @transform_4(%arg0: i32) -> (i32, i32, i32) {
    %c0_i32 = arith.constant 0 : i32
    %c0_i32_0 = arith.constant 0 : i32
    %c0_i32_1 = arith.constant 0 : i32
    %c0_i32_2 = arith.constant 0 : i32
    return %c0_i32, %c0_i32_0, %c0_i32_1 : i32, i32, i32
  }
  func.func @transform_5(%arg0: i32) -> (i32, i32) {
    %c0_i32 = arith.constant 0 : i32
    %c0_i32_0 = arith.constant 0 : i32
    %c0_i32_1 = arith.constant 0 : i32
    return %c0_i32, %c0_i32_0 : i32, i32
  }
  func.func @transform_6(%arg0: i32) -> (i32, i32) {
    %c0_i32 = arith.constant 0 : i32
    %c0_i32_0 = arith.constant 0 : i32
    %c0_i32_1 = arith.constant 0 : i32
    return %c0_i32, %c0_i32_0 : i32, i32
  }
  func.func @transform_7(%arg0: i32) -> (i32, i32) {
    %c0_i32 = arith.constant 0 : i32
    %c0_i32_0 = arith.constant 0 : i32
    return %arg0, %c0_i32 : i32, i32
  }
}

</mosaic_0001>

<bundles_post_ra>
// kernel: tpu_custom_call.1
= control target key start
LH: loop header
LB: loop body
LE: loop exit
PB: predicated region body
PF: predicated region fallthrough
CT: control target
= control target key end

     0   :  { %12 = vsyncpa [#allocation3], 0  ;;  %s631_s0 = inlined_call_operand.hbm [shape: f32[16,128], index: 0, kind: input, shape index: {}]   ;;  %s632_s1 = inlined_call_operand.hbm [shape: f32[128,128], index: 1, kind: input, shape index: {}]   ;;  %s633_s2 = inlined_call_operand.hbm [shape: f32[1,128], index: 2, kind: input, shape index: {}]   ;;  %s634_s3 = inlined_call_operand.hbm [shape: f32[3,128,128], index: 3, kind: input, shape index: {}]   ;;  %s635_s4 = inlined_call_operand.vmem [shape: f32[3,1,128], index: 4, kind: input, shape index: {}]   ;;  %s636_s5 = inlined_call_operand.hbm [shape: f32[128,128], index: 5, kind: input, shape index: {}]   ;;  %s637_s6 = inlined_call_operand.vmem [shape: f32[1,128], index: 6, kind: input, shape index: {}]   ;;  %s638_s7 = inlined_call_operand.hbm [shape: f32[16,128], index: 7, kind: output, shape index: {}]  }
   0x1   :  { %13 = vsyncpa [#allocation6], 0 }
   0x2   :  { %14 = vsyncpa [#allocation9], 0 }
   0x3   :  { %15 = vsyncpa [#allocation4], 0  ;;  %s33_s26 = sshll.u32 %s632_s1, 4  ;;  %s538_s27 = smov [#allocation5]   ;;  %s34_s26 = int_to_ptr.hbm [resolvable:$true] %s33_s26 }
   0x4   :  { %s35_s28 = sshll.u32 %s538_s27, 4  ;;  %s57_s8 = sshll.u32 %s634_s3, 4  ;;  %s36_s28 = int_to_ptr.vmem [resolvable:$true] %s35_s28  ;;  %s58_s8 = int_to_ptr.hbm [resolvable:$true] %s57_s8 }
   0x5   :  { %s539_s9 = smov 128   ;;  %s540_s10 = smov 8  }
   0x6   :  { %41 = dma.hbm_to_vmem [thread:$0]  %s34_s26, 2048, %s36_s28, [#allocation6], %s539_s9, %s539_s9, %s540_s10  }
   0x7   :  { %s541_s11 = smov [#allocation8]   ;;  %s20_s1 = sshll.u32 %s631_s0, 4  ;;  %s21_s1 = int_to_ptr.hbm [resolvable:$true] %s20_s1 }
   0x8   :  { %s59_s12 = sshll.u32 %s541_s11, 4  ;;  %s47_s16 = sshll.u32 %s633_s2, 4  ;;  %s60_s12 = int_to_ptr.vmem [resolvable:$true] %s59_s12  ;;  %s48_s16 = int_to_ptr.hbm [resolvable:$true] %s47_s16 }
   0x9   :  { %65 = dma.hbm_to_vmem [thread:$0]  %s58_s8, 6144, %s60_s12, [#allocation9], %s539_s9, %s539_s9, %s540_s10  }
   0xa   :  { %s542_s17 = smov [#allocation2]   ;;  %s543_s19 = smov [#allocation7]  }
   0xb   :  { %s22_s18 = sshll.u32 %s542_s17, 4  ;;  %s49_s0 = sshll.u32 %s543_s19, 4  ;;  %s23_s18 = int_to_ptr.vmem [resolvable:$true] %s22_s18  ;;  %s50_s0 = int_to_ptr.vmem [resolvable:$true] %s49_s0 }
   0xc   :  { %28 = dma.hbm_to_vmem [thread:$0]  %s21_s1, 256, %s23_s18, [#allocation3], %s539_s9, %s539_s9, %s540_s10  }
   0xd   :  { %s72_s22 = sshll.u32 %s636_s5, 4  ;;  %s544_s23 = smov [#allocation10]   ;;  %s73_s22 = int_to_ptr.hbm [resolvable:$true] %s72_s22 }
   0xe   :  { %52 = dma.hbm_to_vmem [thread:$0]  %s48_s16, 16, %s50_s0, [#allocation6]  }
   0xf   :  { %s74_s24 = sshll.u32 %s544_s23, 4  ;;  %s75_s24 = int_to_ptr.vmem [resolvable:$true] %s74_s24 }
  0x10   :  { %80 = dma.hbm_to_vmem [thread:$0]  %s73_s22, 2048, %s75_s24, [#allocation9], %s539_s9, %s539_s9, %s540_s10  }
  0x11   :  { %530 = dma.done.wait [#allocation3], 256  }
  0x12   :  { %531 = vsyncadd [#allocation3], 4294967040 }
  0x13   :  { %532 = dma.done.wait [#allocation6], 2064  }
  0x14   :  { %533 = vsyncadd [#allocation6], 4294965232 }
  0x15   :  { %534 = dma.done.wait [#allocation9], 8192  }
  0x16   :  { %535 = vsyncadd [#allocation9], 4294959104  ;;  %v120_v0 = vld [vmem:[#allocation5 + $0x78] sm:$0xff]  ;;  %v119_v1 = vld [vmem:[#allocation5 + $0x70] sm:$0xff]  ;;  %s545_s8 = smov [#allocation11]  }
  0x17   :  { %125 = vmatpush.msra.mxu0 %v120_v0  ;;  %v118_v2 = vld [vmem:[#allocation5 + $0x68] sm:$0xff]  ;;  %v117_v3 = vld [vmem:[#allocation5 + $0x60] sm:$0xff]  ;;  %v116_v4 = vld [vmem:[#allocation5 + $0x58] sm:$0xff]  ;;  %s338_s11 = sshll.u32 %s545_s8, 4  ;;  %s339_s11 = int_to_ptr.vmem [resolvable:$true] %s338_s11 }
  0x18   :  { %v115_v5 = vld [vmem:[#allocation5 + $0x50] sm:$0xff]  ;;  %v165_v6 = vld [vmem:[#allocation8 + $0x78] sm:$0xff]  ;;  %v114_v8 = vld [vmem:[#allocation5 + $0x48] sm:$0xff] }
  0x19   :  { %126 = vmatpush.msra.mxu0 %v119_v1  ;;  %v164_v7 = vld [vmem:[#allocation8 + $0x70] sm:$0xff]  ;;  %170 = vmatpush.msra.mxu1 %v165_v6  ;;  %v163_v9 = vld [vmem:[#allocation8 + $0x68] sm:$0xff]  ;;  %v113_v10 = vld [vmem:[#allocation5 + $0x40] sm:$0xff] }
  0x1a   :  { %v162_v11 = vld [vmem:[#allocation8 + $0x60] sm:$0xff]  ;;  %v112_v12 = vld [vmem:[#allocation5 + $0x38] sm:$0xff]  ;;  %v111_v14 = vld [vmem:[#allocation5 + $0x30] sm:$0xff] }
  0x1b   :  { %127 = vmatpush.msra.mxu0 %v118_v2  ;;  %171 = vmatpush.msra.mxu1 %v164_v7  ;;  %v161_v13 = vld [vmem:[#allocation8 + $0x58] sm:$0xff]  ;;  %v160_v15 = vld [vmem:[#allocation8 + $0x50] sm:$0xff]  ;;  %v110_v16 = vld [vmem:[#allocation5 + $0x28] sm:$0xff] }
  0x1c   :  { %v159_v17 = vld [vmem:[#allocation8 + $0x48] sm:$0xff]  ;;  %v109_v18 = vld [vmem:[#allocation5 + $0x20] sm:$0xff]  ;;  %v108_v20 = vld [vmem:[#allocation5 + $0x18] sm:$0xff] }
  0x1d   :  { %128 = vmatpush.msra.mxu0 %v117_v3  ;;  %172 = vmatpush.msra.mxu1 %v163_v9  ;;  %v158_v19 = vld [vmem:[#allocation8 + $0x40] sm:$0xff]  ;;  %v157_v21 = vld [vmem:[#allocation8 + $0x38] sm:$0xff]  ;;  %v107_v22 = vld [vmem:[#allocation5 + $0x10] sm:$0xff] }
  0x1e   :  { %v156_v23 = vld [vmem:[#allocation8 + $0x30] sm:$0xff]  ;;  %v106_v24 = vld [vmem:[#allocation5 + $0x8] sm:$0xff]  ;;  %v105_v26 = vld [vmem:[#allocation5] sm:$0xff] }
  0x1f   :  { %129 = vmatpush.msra.mxu0 %v116_v4  ;;  %173 = vmatpush.msra.mxu1 %v162_v11  ;;  %v155_v25 = vld [vmem:[#allocation8 + $0x28] sm:$0xff]  ;;  %v154_v27 = vld [vmem:[#allocation8 + $0x20] sm:$0xff]  ;;  %v153_v29 = vld [vmem:[#allocation8 + $0x18] sm:$0xff] }
  0x20   :  { %v103_v28 = vld [vmem:[#allocation2] sm:$0xff]  ;;  %v104_v30 = vld [vmem:[#allocation2 + $0x8] sm:$0xff]  ;;  %v150_v33 = vld [vmem:[#allocation8] sm:$0xff] }
  0x21   :  { %130 = vmatpush.msra.mxu0 %v115_v5  ;;  %174 = vmatpush.msra.mxu1 %v161_v13  ;;  %v152_v31 = vld [vmem:[#allocation8 + $0x10] sm:$0xff]  ;;  %v151_v32 = vld [vmem:[#allocation8 + $0x8] sm:$0xff]  ;;  %v211_v34 = vld [vmem:[#allocation8 + $0xf8] sm:$0xff] }
  0x22   :  { %v210_v35 = vld [vmem:[#allocation8 + $0xf0] sm:$0xff]  ;;  %217 = vmatpush.msra.mxu2 %v211_v34  ;;  %v209_v36 = vld [vmem:[#allocation8 + $0xe8] sm:$0xff]  ;;  %v208_v37 = vld [vmem:[#allocation8 + $0xe0] sm:$0xff] }
  0x23   :  { %131 = vmatpush.msra.mxu0 %v114_v8  ;;  %175 = vmatpush.msra.mxu1 %v160_v15  ;;  %v207_v38 = vld [vmem:[#allocation8 + $0xd8] sm:$0xff]  ;;  %v206_v39 = vld [vmem:[#allocation8 + $0xd0] sm:$0xff]  ;;  %v205_v40 = vld [vmem:[#allocation8 + $0xc8] sm:$0xff] }
  0x24   :  { %218 = vmatpush.msra.mxu2 %v210_v35  ;;  %v204_v41 = vld [vmem:[#allocation8 + $0xc0] sm:$0xff]  ;;  %v203_v42 = vld [vmem:[#allocation8 + $0xb8] sm:$0xff]  ;;  %v202_v44 = vld [vmem:[#allocation8 + $0xb0] sm:$0xff] }
  0x25   :  { %132 = vmatpush.msra.mxu0 %v113_v10  ;;  %176 = vmatpush.msra.mxu1 %v159_v17  ;;  %v381_v43 = vld [vmem:[#allocation7] ss:$0 sm:$0xff]  ;;  %v201_v45 = vld [vmem:[#allocation8 + $0xa8] sm:$0xff]  ;;  %v200_v48 = vld [vmem:[#allocation8 + $0xa0] sm:$0xff] }
  0x26   :  { %219 = vmatpush.msra.mxu2 %v209_v36  ;;  %v199_v50 = vld [vmem:[#allocation8 + $0x98] sm:$0xff]  ;;  %v198_v54 = vld [vmem:[#allocation8 + $0x90] sm:$0xff]  ;;  %v197_v55 = vld [vmem:[#allocation8 + $0x88] sm:$0xff] }
  0x27   :  { %133 = vmatpush.msra.mxu0 %v112_v12  ;;  %177 = vmatpush.msra.mxu1 %v158_v19  ;;  %v196_v56 = vld [vmem:[#allocation8 + $0x80] sm:$0xff]  ;;  %v258_v57 = vld [vmem:[#allocation8 + $0x178] sm:$0xff]  ;;  %v257_v58 = vld [vmem:[#allocation8 + $0x170] sm:$0xff] }
  0x28   :  { %220 = vmatpush.msra.mxu2 %v208_v37  ;;  %264 = vmatpush.msra.mxu3 %v258_v57  ;;  %v256_v59 = vld [vmem:[#allocation8 + $0x168] sm:$0xff]  ;;  %v255_v60 = vld [vmem:[#allocation8 + $0x160] sm:$0xff]  ;;  %v254_v61 = vld [vmem:[#allocation8 + $0x158] sm:$0xff] }
  0x29   :  { %134 = vmatpush.msra.mxu0 %v111_v14  ;;  %178 = vmatpush.msra.mxu1 %v157_v21  ;;  %v253_v62 = vld [vmem:[#allocation8 + $0x150] sm:$0xff]  ;;  %v252_v63 = vld [vmem:[#allocation8 + $0x148] sm:$0xff]  ;;  %v251_v0 = vld [vmem:[#allocation8 + $0x140] sm:$0xff] }
  0x2a   :  { %221 = vmatpush.msra.mxu2 %v207_v38  ;;  %265 = vmatpush.msra.mxu3 %v257_v58  ;;  %v250_v1 = vld [vmem:[#allocation8 + $0x138] sm:$0xff]  ;;  %v382_v2 = vld [vmem:[%s635_s4] ss:$0 sm:$0xff]  ;;  %v249_v3 = vld [vmem:[#allocation8 + $0x130] sm:$0xff] }
  0x2b   :  { %135 = vmatpush.msra.mxu0 %v110_v16  ;;  %179 = vmatpush.msra.mxu1 %v156_v23  ;;  %v248_v4 = vld [vmem:[#allocation8 + $0x128] sm:$0xff]  ;;  %v247_v7 = vld [vmem:[#allocation8 + $0x120] sm:$0xff]  ;;  %v246_v9 = vld [vmem:[#allocation8 + $0x118] sm:$0xff] }
  0x2c   :  { %222 = vmatpush.msra.mxu2 %v206_v39  ;;  %266 = vmatpush.msra.mxu3 %v256_v59  ;;  %v245_v13 = vld [vmem:[#allocation8 + $0x110] sm:$0xff]  ;;  %v244_v14 = vld [vmem:[#allocation8 + $0x108] sm:$0xff]  ;;  %v243_v15 = vld [vmem:[#allocation8 + $0x100] sm:$0xff] }
  0x2d   :  { %136 = vmatpush.msra.mxu0 %v109_v18  ;;  %180 = vmatpush.msra.mxu1 %v155_v25  ;;  %v304_v16 = vld [vmem:[#allocation10 + $0x78] sm:$0xff]  ;;  %v303_v17 = vld [vmem:[#allocation10 + $0x70] sm:$0xff]  ;;  %v302_v18 = vld [vmem:[#allocation10 + $0x68] sm:$0xff] }
  0x2e   :  { %223 = vmatpush.msra.mxu2 %v205_v40  ;;  %267 = vmatpush.msra.mxu3 %v255_v60  ;;  %v301_v19 = vld [vmem:[#allocation10 + $0x60] sm:$0xff]  ;;  %v299_v21 = vld [vmem:[#allocation10 + $0x50] sm:$0xff]  ;;  %v383_v25 = vld [vmem:[%s635_s4 + $0x1] ss:$0 sm:$0xff] }
  0x2f   :  { %137 = vmatpush.msra.mxu0 %v108_v20  ;;  %181 = vmatpush.msra.mxu1 %v154_v27  ;;  %v300_v20 = vld [vmem:[#allocation10 + $0x58] sm:$0xff]  ;;  %v297_v23 = vld [vmem:[#allocation10 + $0x40] sm:$0xff]  ;;  %v294_v27 = vld [vmem:[#allocation10 + $0x28] sm:$0xff] }
  0x30   :  { %224 = vmatpush.msra.mxu2 %v204_v41  ;;  %268 = vmatpush.msra.mxu3 %v254_v61  ;;  %v291_v36 = vld [vmem:[#allocation10 + $0x10] sm:$0xff]  ;;  %v290_v37 = vld [vmem:[#allocation10 + $0x8] sm:$0xff]  ;;  %v289_v38 = vld [vmem:[#allocation10] sm:$0xff] }
  0x31   :  { %138 = vmatpush.msra.mxu0 %v107_v22  ;;  %182 = vmatpush.msra.mxu1 %v153_v29  ;;  %v298_v22 = vld [vmem:[#allocation10 + $0x48] sm:$0xff]  ;;  %v384_v39 = vld [vmem:[%s635_s4 + $0x2] ss:$0 sm:$0xff]  ;;  %s340_s4 = sshll.u32 %s638_s7, 4  ;;  %s341_s4 = int_to_ptr.hbm [resolvable:$true] %s340_s4 }
  0x32   :  { %225 = vmatpush.msra.mxu2 %v203_v42  ;;  %269 = vmatpush.msra.mxu3 %v253_v62 }
  0x33   :  { %139 = vmatpush.msra.mxu0 %v106_v24  ;;  %183 = vmatpush.msra.mxu1 %v152_v31  ;;  %v296_v24 = vld [vmem:[#allocation10 + $0x38] sm:$0xff] }
  0x34   :  { %226 = vmatpush.msra.mxu2 %v202_v44  ;;  %270 = vmatpush.msra.mxu3 %v252_v63 }
  0x35   :  { %140 = vmatpush.msra.mxu0 %v105_v26  ;;  %184 = vmatpush.msra.mxu1 %v151_v32  ;;  %v295_v26 = vld [vmem:[#allocation10 + $0x30] sm:$0xff]  ;;  %v292_v32 = vld [vmem:[#allocation10 + $0x18] sm:$0xff] }
  0x36   :  { %141 = vmatmul.f32.vlgmr.msra.gmra.mxu0 %v103_v28  ;;  %227 = vmatpush.msra.mxu2 %v201_v45 }
  0x37   :  { %185 = vmatpush.msra.mxu1 %v150_v33  ;;  %271 = vmatpush.msra.mxu3 %v251_v0 }
  0x38   :  { %228 = vmatpush.msra.mxu2 %v200_v48  ;;  %309 = vmatpush.msrb.mxu0 %v304_v16 }
  0x39   :  { %272 = vmatpush.msra.mxu3 %v250_v1  ;;  %357 = vmatpush.msrb.mxu1 %v304_v16 }
  0x3a   :  { %229 = vmatpush.msra.mxu2 %v199_v50  ;;  %310 = vmatpush.msrb.mxu0 %v303_v17 }
  0x3b   :  { %273 = vmatpush.msra.mxu3 %v249_v3  ;;  %358 = vmatpush.msrb.mxu1 %v303_v17 }
  0x3c   :  { %230 = vmatpush.msra.mxu2 %v198_v54  ;;  %311 = vmatpush.msrb.mxu0 %v302_v18 }
  0x3d   :  { %274 = vmatpush.msra.mxu3 %v248_v4  ;;  %359 = vmatpush.msrb.mxu1 %v302_v18 }
  0x3e   :  { %144 = vmatmul.f32.gmra.mxu0 %v104_v30  ;;  %231 = vmatpush.msra.mxu2 %v197_v55  ;;  %v293_v30 = vld [vmem:[#allocation10 + $0x20] sm:$0xff] }
  0x3f   :  { %275 = vmatpush.msra.mxu3 %v247_v7  ;;  %312 = vmatpush.msrb.mxu0 %v301_v19 }
  0x40   :  { %232 = vmatpush.msra.mxu2 %v196_v56  ;;  %360 = vmatpush.msrb.mxu1 %v301_v19 }
  0x41   :  { %276 = vmatpush.msra.mxu3 %v246_v9  ;;  %313 = vmatpush.msrb.mxu0 %v300_v20 }
  0x42   :  { %361 = vmatpush.msrb.mxu1 %v300_v20 }
  0x43   :  { %277 = vmatpush.msra.mxu3 %v245_v13  ;;  %314 = vmatpush.msrb.mxu0 %v299_v21 }
  0x44   :  { %362 = vmatpush.msrb.mxu1 %v299_v21 }
  0x45   :  { %278 = vmatpush.msra.mxu3 %v244_v14  ;;  %315 = vmatpush.msrb.mxu0 %v298_v22 }
  0x46   :  { %363 = vmatpush.msrb.mxu1 %v298_v22 }
  0x47   :  { %279 = vmatpush.msra.mxu3 %v243_v15  ;;  %316 = vmatpush.msrb.mxu0 %v297_v23 }
  0x48   :  { %364 = vmatpush.msrb.mxu1 %v297_v23 }
  0x49   :  { %317 = vmatpush.msrb.mxu0 %v296_v24 }
  0x4a   :  { %365 = vmatpush.msrb.mxu1 %v296_v24 }
  0x4b   :  { %318 = vmatpush.msrb.mxu0 %v295_v26 }
  0x4c   :  { %366 = vmatpush.msrb.mxu1 %v295_v26 }
  0x4d   :  { %319 = vmatpush.msrb.mxu0 %v294_v27 }
  0x4e   :  { %367 = vmatpush.msrb.mxu1 %v294_v27 }
  0x4f   :  { %320 = vmatpush.msrb.mxu0 %v293_v30 }
  0x50   :  { %368 = vmatpush.msrb.mxu1 %v293_v30 }
  0x51   :  { %321 = vmatpush.msrb.mxu0 %v292_v32 }
  0x52   :  { %369 = vmatpush.msrb.mxu1 %v292_v32 }
  0x53   :  { %322 = vmatpush.msrb.mxu0 %v291_v36 }
  0x54   :  { %370 = vmatpush.msrb.mxu1 %v291_v36 }
  0x55   :  { %323 = vmatpush.msrb.mxu0 %v290_v37 }
  0x56   :  { %371 = vmatpush.msrb.mxu1 %v290_v37 }
  0x57   :  { %324 = vmatpush.msrb.mxu0 %v289_v38 }
  0x58   :  { %372 = vmatpush.msrb.mxu1 %v289_v38 }
  0xb3   :  { %v142_v46 = vpop.f32.mrf.mxu0 }
  0xb4   :  { %v143_v47 = vadd.f32 %v381_v43, %v142_v46  ;;  %v385_v46 = vld [vmem:[%s637_s6] ss:$0 sm:$0xff] }
  0xb6   :  { %v148_v49 = vmax.f32 %v143_v47, 0.0 }
  0xb8   :  { %186 = vmatmul.f32.vlgmr.msra.gmra.mxu1 %v148_v49 }
  0xbb   :  { %v145_v51 = vpop.f32.mrf.mxu0 }
  0xbc   :  { %v146_v52 = vadd.f32 %v381_v43, %v145_v51 }
  0xbe   :  { %v149_v53 = vmax.f32 %v146_v52, 0.0 }
  0xc0   :  { %189 = vmatmul.f32.gmra.mxu1 %v149_v53 }
 0x135   :  { %v187_v5 = vpop.f32.mrf.mxu1 }
 0x136   :  { %v188_v6 = vadd.f32 %v382_v2, %v187_v5 }
 0x138   :  { %v193_v8 = vmax.f32 %v188_v6, 0.0 }
 0x13a   :  { %233 = vmatmul.f32.vlgmr.msra.gmra.mxu2 %v193_v8 }
 0x13d   :  { %v190_v10 = vpop.f32.mrf.mxu1 }
 0x13e   :  { %v191_v11 = vadd.f32 %v382_v2, %v190_v10 }
 0x140   :  { %v194_v12 = vmax.f32 %v191_v11, 0.0 }
 0x142   :  { %236 = vmatmul.f32.gmra.mxu2 %v194_v12 }
 0x1bd   :  { %v234_v28 = vpop.f32.mrf.mxu2 }
 0x1be   :  { %v235_v29 = vadd.f32 %v383_v25, %v234_v28 }
 0x1c0   :  { %v240_v31 = vmax.f32 %v235_v29, 0.0 }
 0x1c2   :  { %280 = vmatmul.f32.vlgmr.msra.gmra.mxu3 %v240_v31 }
 0x1c5   :  { %v237_v33 = vpop.f32.mrf.mxu2 }
 0x1c6   :  { %v238_v34 = vadd.f32 %v383_v25, %v237_v33 }
 0x1c8   :  { %v241_v35 = vmax.f32 %v238_v34, 0.0 }
 0x1ca   :  { %283 = vmatmul.f32.gmra.mxu3 %v241_v35 }
 0x245   :  { %v281_v40 = vpop.f32.mrf.mxu3 }
 0x246   :  { %v282_v41 = vadd.f32 %v384_v39, %v281_v40 }
 0x248   :  { %v287_v42 = vmax.f32 %v282_v41, 0.0 }
 0x24a   :  { %325 = vmatmul.f32.vlgmr.msrb.gmra.mxu0 %v287_v42 }
 0x24d   :  { %v284_v43 = vpop.f32.mrf.mxu3 }
 0x24e   :  { %v285_v44 = vadd.f32 %v384_v39, %v284_v43 }
 0x250   :  { %v288_v45 = vmax.f32 %v285_v44, 0.0 }
 0x252   :  { %328 = vmatmul.f32.vlgmr.msrb.gmra.mxu1 %v288_v45 }
 0x2c7   :  { %v326_v47 = vpop.f32.mrf.mxu0 }
 0x2c8   :  { %v327_v48 = vadd.f32 %v385_v46, %v326_v47 }
 0x2ca   :  { %332 = vst [vmem:[#allocation11] sm:$0xff] %v327_v48 }
 0x2cf   :  { %v329_v49 = vpop.f32.mrf.mxu1 }
 0x2d0   :  { %v330_v50 = vadd.f32 %v385_v46, %v329_v49 }
 0x2d2   :  { %333 = vst [vmem:[#allocation11 + $0x8] sm:$0xff] %v330_v50 }
 0x2d3   :  { %346 = dma.vmem_to_hbm [thread:$0]  %s339_s11, 256, %s341_s4, [#allocation4], %s539_s9, %s539_s9, %s540_s10  }
 0x2d4   :  { %536 = dma.done.wait [#allocation4], 256  }
 0x2d5   :  { %537 = vsyncadd [#allocation4], 4294967040 }
 0x2d6   :  { %351 = vsyncpa [#allocation3], 1 }
 0x2d7   :  { %352 = vsyncpa [#allocation6], 1 }
 0x2d8   :  { %353 = vsyncpa [#allocation9], 1 }
 0x2d9   :  { %354 = vsyncpa [#allocation4], 1 }

// kernel: tpu_custom_call.1
= control target key start
LH: loop header
LB: loop body
LE: loop exit
PB: predicated region body
PF: predicated region fallthrough
CT: control target
= control target key end

     0   :  { %12 = vsyncpa [#allocation3], 0  ;;  %s631_s0 = inlined_call_operand.hbm [shape: f32[16,128], index: 0, kind: input, shape index: {}]   ;;  %s632_s1 = inlined_call_operand.hbm [shape: f32[128,128], index: 1, kind: input, shape index: {}]   ;;  %s633_s2 = inlined_call_operand.hbm [shape: f32[1,128], index: 2, kind: input, shape index: {}]   ;;  %s634_s3 = inlined_call_operand.hbm [shape: f32[3,128,128], index: 3, kind: input, shape index: {}]   ;;  %s635_s4 = inlined_call_operand.vmem [shape: f32[3,1,128], index: 4, kind: input, shape index: {}]   ;;  %s636_s5 = inlined_call_operand.hbm [shape: f32[128,128], index: 5, kind: input, shape index: {}]   ;;  %s637_s6 = inlined_call_operand.vmem [shape: f32[1,128], index: 6, kind: input, shape index: {}]   ;;  %s638_s7 = inlined_call_operand.hbm [shape: f32[16,128], index: 7, kind: output, shape index: {}]  }
   0x1   :  { %13 = vsyncpa [#allocation6], 0 }
   0x2   :  { %14 = vsyncpa [#allocation9], 0 }
   0x3   :  { %15 = vsyncpa [#allocation4], 0  ;;  %s33_s26 = sshll.u32 %s632_s1, 4  ;;  %s538_s27 = smov [#allocation5]   ;;  %s34_s26 = int_to_ptr.hbm [resolvable:$true] %s33_s26 }
   0x4   :  { %s35_s28 = sshll.u32 %s538_s27, 4  ;;  %s57_s8 = sshll.u32 %s634_s3, 4  ;;  %s36_s28 = int_to_ptr.vmem [resolvable:$true] %s35_s28  ;;  %s58_s8 = int_to_ptr.hbm [resolvable:$true] %s57_s8 }
   0x5   :  { %s539_s9 = smov 128   ;;  %s540_s10 = smov 8  }
   0x6   :  { %41 = dma.hbm_to_vmem [thread:$0]  %s34_s26, 2048, %s36_s28, [#allocation6], %s539_s9, %s539_s9, %s540_s10  }
   0x7   :  { %s541_s11 = smov [#allocation8]   ;;  %s20_s1 = sshll.u32 %s631_s0, 4  ;;  %s21_s1 = int_to_ptr.hbm [resolvable:$true] %s20_s1 }
   0x8   :  { %s59_s12 = sshll.u32 %s541_s11, 4  ;;  %s47_s16 = sshll.u32 %s633_s2, 4  ;;  %s60_s12 = int_to_ptr.vmem [resolvable:$true] %s59_s12  ;;  %s48_s16 = int_to_ptr.hbm [resolvable:$true] %s47_s16 }
   0x9   :  { %65 = dma.hbm_to_vmem [thread:$0]  %s58_s8, 6144, %s60_s12, [#allocation9], %s539_s9, %s539_s9, %s540_s10  }
   0xa   :  { %s542_s17 = smov [#allocation2]   ;;  %s543_s19 = smov [#allocation7]  }
   0xb   :  { %s22_s18 = sshll.u32 %s542_s17, 4  ;;  %s49_s0 = sshll.u32 %s543_s19, 4  ;;  %s23_s18 = int_to_ptr.vmem [resolvable:$true] %s22_s18  ;;  %s50_s0 = int_to_ptr.vmem [resolvable:$true] %s49_s0 }
   0xc   :  { %28 = dma.hbm_to_vmem [thread:$0]  %s21_s1, 256, %s23_s18, [#allocation3], %s539_s9, %s539_s9, %s540_s10  }
   0xd   :  { %s72_s22 = sshll.u32 %s636_s5, 4  ;;  %s544_s23 = smov [#allocation10]   ;;  %s73_s22 = int_to_ptr.hbm [resolvable:$true] %s72_s22 }
   0xe   :  { %52 = dma.hbm_to_vmem [thread:$0]  %s48_s16, 16, %s50_s0, [#allocation6]  }
   0xf   :  { %s74_s24 = sshll.u32 %s544_s23, 4  ;;  %s75_s24 = int_to_ptr.vmem [resolvable:$true] %s74_s24 }
  0x10   :  { %80 = dma.hbm_to_vmem [thread:$0]  %s73_s22, 2048, %s75_s24, [#allocation9], %s539_s9, %s539_s9, %s540_s10  }
  0x11   :  { %530 = dma.done.wait [#allocation3], 256  }
  0x12   :  { %531 = vsyncadd [#allocation3], 4294967040 }
  0x13   :  { %532 = dma.done.wait [#allocation6], 2064  }
  0x14   :  { %533 = vsyncadd [#allocation6], 4294965232 }
  0x15   :  { %534 = dma.done.wait [#allocation9], 8192  }
  0x16   :  { %535 = vsyncadd [#allocation9], 4294959104  ;;  %v120_v0 = vld [vmem:[#allocation5 + $0x78] sm:$0xff]  ;;  %v119_v1 = vld [vmem:[#allocation5 + $0x70] sm:$0xff]  ;;  %s545_s8 = smov [#allocation11]  }
  0x17   :  { %125 = vmatpush.msra.mxu0 %v120_v0  ;;  %v118_v2 = vld [vmem:[#allocation5 + $0x68] sm:$0xff]  ;;  %v117_v3 = vld [vmem:[#allocation5 + $0x60] sm:$0xff]  ;;  %v116_v4 = vld [vmem:[#allocation5 + $0x58] sm:$0xff]  ;;  %s338_s11 = sshll.u32 %s545_s8, 4  ;;  %s339_s11 = int_to_ptr.vmem [resolvable:$true] %s338_s11 }
  0x18   :  { %v115_v5 = vld [vmem:[#allocation5 + $0x50] sm:$0xff]  ;;  %v165_v6 = vld [vmem:[#allocation8 + $0x78] sm:$0xff]  ;;  %v114_v8 = vld [vmem:[#allocation5 + $0x48] sm:$0xff] }
  0x19   :  { %126 = vmatpush.msra.mxu0 %v119_v1  ;;  %v164_v7 = vld [vmem:[#allocation8 + $0x70] sm:$0xff]  ;;  %170 = vmatpush.msra.mxu1 %v165_v6  ;;  %v163_v9 = vld [vmem:[#allocation8 + $0x68] sm:$0xff]  ;;  %v113_v10 = vld [vmem:[#allocation5 + $0x40] sm:$0xff] }
  0x1a   :  { %v162_v11 = vld [vmem:[#allocation8 + $0x60] sm:$0xff]  ;;  %v112_v12 = vld [vmem:[#allocation5 + $0x38] sm:$0xff]  ;;  %v111_v14 = vld [vmem:[#allocation5 + $0x30] sm:$0xff] }
  0x1b   :  { %127 = vmatpush.msra.mxu0 %v118_v2  ;;  %171 = vmatpush.msra.mxu1 %v164_v7  ;;  %v161_v13 = vld [vmem:[#allocation8 + $0x58] sm:$0xff]  ;;  %v160_v15 = vld [vmem:[#allocation8 + $0x50] sm:$0xff]  ;;  %v110_v16 = vld [vmem:[#allocation5 + $0x28] sm:$0xff] }
  0x1c   :  { %v159_v17 = vld [vmem:[#allocation8 + $0x48] sm:$0xff]  ;;  %v109_v18 = vld [vmem:[#allocation5 + $0x20] sm:$0xff]  ;;  %v108_v20 = vld [vmem:[#allocation5 + $0x18] sm:$0xff] }
  0x1d   :  { %128 = vmatpush.msra.mxu0 %v117_v3  ;;  %172 = vmatpush.msra.mxu1 %v163_v9  ;;  %v158_v19 = vld [vmem:[#allocation8 + $0x40] sm:$0xff]  ;;  %v157_v21 = vld [vmem:[#allocation8 + $0x38] sm:$0xff]  ;;  %v107_v22 = vld [vmem:[#allocation5 + $0x10] sm:$0xff] }
  0x1e   :  { %v156_v23 = vld [vmem:[#allocation8 + $0x30] sm:$0xff]  ;;  %v106_v24 = vld [vmem:[#allocation5 + $0x8] sm:$0xff]  ;;  %v105_v26 = vld [vmem:[#allocation5] sm:$0xff] }
  0x1f   :  { %129 = vmatpush.msra.mxu0 %v116_v4  ;;  %173 = vmatpush.msra.mxu1 %v162_v11  ;;  %v155_v25 = vld [vmem:[#allocation8 + $0x28] sm:$0xff]  ;;  %v154_v27 = vld [vmem:[#allocation8 + $0x20] sm:$0xff]  ;;  %v153_v29 = vld [vmem:[#allocation8 + $0x18] sm:$0xff] }
  0x20   :  { %v103_v28 = vld [vmem:[#allocation2] sm:$0xff]  ;;  %v104_v30 = vld [vmem:[#allocation2 + $0x8] sm:$0xff]  ;;  %v150_v33 = vld [vmem:[#allocation8] sm:$0xff] }
  0x21   :  { %130 = vmatpush.msra.mxu0 %v115_v5  ;;  %174 = vmatpush.msra.mxu1 %v161_v13  ;;  %v152_v31 = vld [vmem:[#allocation8 + $0x10] sm:$0xff]  ;;  %v151_v32 = vld [vmem:[#allocation8 + $0x8] sm:$0xff]  ;;  %v211_v34 = vld [vmem:[#allocation8 + $0xf8] sm:$0xff] }
  0x22   :  { %v210_v35 = vld [vmem:[#allocation8 + $0xf0] sm:$0xff]  ;;  %217 = vmatpush.msra.mxu2 %v211_v34  ;;  %v209_v36 = vld [vmem:[#allocation8 + $0xe8] sm:$0xff]  ;;  %v208_v37 = vld [vmem:[#allocation8 + $0xe0] sm:$0xff] }
  0x23   :  { %131 = vmatpush.msra.mxu0 %v114_v8  ;;  %175 = vmatpush.msra.mxu1 %v160_v15  ;;  %v207_v38 = vld [vmem:[#allocation8 + $0xd8] sm:$0xff]  ;;  %v206_v39 = vld [vmem:[#allocation8 + $0xd0] sm:$0xff]  ;;  %v205_v40 = vld [vmem:[#allocation8 + $0xc8] sm:$0xff] }
  0x24   :  { %218 = vmatpush.msra.mxu2 %v210_v35  ;;  %v204_v41 = vld [vmem:[#allocation8 + $0xc0] sm:$0xff]  ;;  %v203_v42 = vld [vmem:[#allocation8 + $0xb8] sm:$0xff]  ;;  %v202_v44 = vld [vmem:[#allocation8 + $0xb0] sm:$0xff] }
  0x25   :  { %132 = vmatpush.msra.mxu0 %v113_v10  ;;  %176 = vmatpush.msra.mxu1 %v159_v17  ;;  %v381_v43 = vld [vmem:[#allocation7] ss:$0 sm:$0xff]  ;;  %v201_v45 = vld [vmem:[#allocation8 + $0xa8] sm:$0xff]  ;;  %v200_v48 = vld [vmem:[#allocation8 + $0xa0] sm:$0xff] }
  0x26   :  { %219 = vmatpush.msra.mxu2 %v209_v36  ;;  %v199_v50 = vld [vmem:[#allocation8 + $0x98] sm:$0xff]  ;;  %v198_v54 = vld [vmem:[#allocation8 + $0x90] sm:$0xff]  ;;  %v197_v55 = vld [vmem:[#allocation8 + $0x88] sm:$0xff] }
  0x27   :  { %133 = vmatpush.msra.mxu0 %v112_v12  ;;  %177 = vmatpush.msra.mxu1 %v158_v19  ;;  %v196_v56 = vld [vmem:[#allocation8 + $0x80] sm:$0xff]  ;;  %v258_v57 = vld [vmem:[#allocation8 + $0x178] sm:$0xff]  ;;  %v257_v58 = vld [vmem:[#allocation8 + $0x170] sm:$0xff] }
  0x28   :  { %220 = vmatpush.msra.mxu2 %v208_v37  ;;  %264 = vmatpush.msra.mxu3 %v258_v57  ;;  %v256_v59 = vld [vmem:[#allocation8 + $0x168] sm:$0xff]  ;;  %v255_v60 = vld [vmem:[#allocation8 + $0x160] sm:$0xff]  ;;  %v254_v61 = vld [vmem:[#allocation8 + $0x158] sm:$0xff] }
  0x29   :  { %134 = vmatpush.msra.mxu0 %v111_v14  ;;  %178 = vmatpush.msra.mxu1 %v157_v21  ;;  %v253_v62 = vld [vmem:[#allocation8 + $0x150] sm:$0xff]  ;;  %v252_v63 = vld [vmem:[#allocation8 + $0x148] sm:$0xff]  ;;  %v251_v0 = vld [vmem:[#allocation8 + $0x140] sm:$0xff] }
  0x2a   :  { %221 = vmatpush.msra.mxu2 %v207_v38  ;;  %265 = vmatpush.msra.mxu3 %v257_v58  ;;  %v250_v1 = vld [vmem:[#allocation8 + $0x138] sm:$0xff]  ;;  %v382_v2 = vld [vmem:[%s635_s4] ss:$0 sm:$0xff]  ;;  %v249_v3 = vld [vmem:[#allocation8 + $0x130] sm:$0xff] }
  0x2b   :  { %135 = vmatpush.msra.mxu0 %v110_v16  ;;  %179 = vmatpush.msra.mxu1 %v156_v23  ;;  %v248_v4 = vld [vmem:[#allocation8 + $0x128] sm:$0xff]  ;;  %v247_v7 = vld [vmem:[#allocation8 + $0x120] sm:$0xff]  ;;  %v246_v9 = vld [vmem:[#allocation8 + $0x118] sm:$0xff] }
  0x2c   :  { %222 = vmatpush.msra.mxu2 %v206_v39  ;;  %266 = vmatpush.msra.mxu3 %v256_v59  ;;  %v245_v13 = vld [vmem:[#allocation8 + $0x110] sm:$0xff]  ;;  %v244_v14 = vld [vmem:[#allocation8 + $0x108] sm:$0xff]  ;;  %v243_v15 = vld [vmem:[#allocation8 + $0x100] sm:$0xff] }
  0x2d   :  { %136 = vmatpush.msra.mxu0 %v109_v18  ;;  %180 = vmatpush.msra.mxu1 %v155_v25  ;;  %v304_v16 = vld [vmem:[#allocation10 + $0x78] sm:$0xff]  ;;  %v303_v17 = vld [vmem:[#allocation10 + $0x70] sm:$0xff]  ;;  %v302_v18 = vld [vmem:[#allocation10 + $0x68] sm:$0xff] }
  0x2e   :  { %223 = vmatpush.msra.mxu2 %v205_v40  ;;  %267 = vmatpush.msra.mxu3 %v255_v60  ;;  %v301_v19 = vld [vmem:[#allocation10 + $0x60] sm:$0xff]  ;;  %v299_v21 = vld [vmem:[#allocation10 + $0x50] sm:$0xff]  ;;  %v383_v25 = vld [vmem:[%s635_s4 + $0x1] ss:$0 sm:$0xff] }
  0x2f   :  { %137 = vmatpush.msra.mxu0 %v108_v20  ;;  %181 = vmatpush.msra.mxu1 %v154_v27  ;;  %v300_v20 = vld [vmem:[#allocation10 + $0x58] sm:$0xff]  ;;  %v297_v23 = vld [vmem:[#allocation10 + $0x40] sm:$0xff]  ;;  %v294_v27 = vld [vmem:[#allocation10 + $0x28] sm:$0xff] }
  0x30   :  { %224 = vmatpush.msra.mxu2 %v204_v41  ;;  %268 = vmatpush.msra.mxu3 %v254_v61  ;;  %v291_v36 = vld [vmem:[#allocation10 + $0x10] sm:$0xff]  ;;  %v290_v37 = vld [vmem:[#allocation10 + $0x8] sm:$0xff]  ;;  %v289_v38 = vld [vmem:[#allocation10] sm:$0xff] }
  0x31   :  { %138 = vmatpush.msra.mxu0 %v107_v22  ;;  %182 = vmatpush.msra.mxu1 %v153_v29  ;;  %v298_v22 = vld [vmem:[#allocation10 + $0x48] sm:$0xff]  ;;  %v384_v39 = vld [vmem:[%s635_s4 + $0x2] ss:$0 sm:$0xff]  ;;  %s340_s4 = sshll.u32 %s638_s7, 4  ;;  %s341_s4 = int_to_ptr.hbm [resolvable:$true] %s340_s4 }
  0x32   :  { %225 = vmatpush.msra.mxu2 %v203_v42  ;;  %269 = vmatpush.msra.mxu3 %v253_v62 }
  0x33   :  { %139 = vmatpush.msra.mxu0 %v106_v24  ;;  %183 = vmatpush.msra.mxu1 %v152_v31  ;;  %v296_v24 = vld [vmem:[#allocation10 + $0x38] sm:$0xff] }
  0x34   :  { %226 = vmatpush.msra.mxu2 %v202_v44  ;;  %270 = vmatpush.msra.mxu3 %v252_v63 }
  0x35   :  { %140 = vmatpush.msra.mxu0 %v105_v26  ;;  %184 = vmatpush.msra.mxu1 %v151_v32  ;;  %v295_v26 = vld [vmem:[#allocation10 + $0x30] sm:$0xff]  ;;  %v292_v32 = vld [vmem:[#allocation10 + $0x18] sm:$0xff] }
  0x36   :  { %141 = vmatmul.f32.vlgmr.msra.gmra.mxu0 %v103_v28  ;;  %227 = vmatpush.msra.mxu2 %v201_v45 }
  0x37   :  { %185 = vmatpush.msra.mxu1 %v150_v33  ;;  %271 = vmatpush.msra.mxu3 %v251_v0 }
  0x38   :  { %228 = vmatpush.msra.mxu2 %v200_v48  ;;  %309 = vmatpush.msrb.mxu0 %v304_v16 }
  0x39   :  { %272 = vmatpush.msra.mxu3 %v250_v1  ;;  %357 = vmatpush.msrb.mxu1 %v304_v16 }
  0x3a   :  { %229 = vmatpush.msra.mxu2 %v199_v50  ;;  %310 = vmatpush.msrb.mxu0 %v303_v17 }
  0x3b   :  { %273 = vmatpush.msra.mxu3 %v249_v3  ;;  %358 = vmatpush.msrb.mxu1 %v303_v17 }
  0x3c   :  { %230 = vmatpush.msra.mxu2 %v198_v54  ;;  %311 = vmatpush.msrb.mxu0 %v302_v18 }
  0x3d   :  { %274 = vmatpush.msra.mxu3 %v248_v4  ;;  %359 = vmatpush.msrb.mxu1 %v302_v18 }
  0x3e   :  { %144 = vmatmul.f32.gmra.mxu0 %v104_v30  ;;  %231 = vmatpush.msra.mxu2 %v197_v55  ;;  %v293_v30 = vld [vmem:[#allocation10 + $0x20] sm:$0xff] }
  0x3f   :  { %275 = vmatpush.msra.mxu3 %v247_v7  ;;  %312 = vmatpush.msrb.mxu0 %v301_v19 }
  0x40   :  { %232 = vmatpush.msra.mxu2 %v196_v56  ;;  %360 = vmatpush.msrb.mxu1 %v301_v19 }
  0x41   :  { %276 = vmatpush.msra.mxu3 %v246_v9  ;;  %313 = vmatpush.msrb.mxu0 %v300_v20 }
  0x42   :  { %361 = vmatpush.msrb.mxu1 %v300_v20 }
  0x43   :  { %277 = vmatpush.msra.mxu3 %v245_v13  ;;  %314 = vmatpush.msrb.mxu0 %v299_v21 }
  0x44   :  { %362 = vmatpush.msrb.mxu1 %v299_v21 }
  0x45   :  { %278 = vmatpush.msra.mxu3 %v244_v14  ;;  %315 = vmatpush.msrb.mxu0 %v298_v22 }
  0x46   :  { %363 = vmatpush.msrb.mxu1 %v298_v22 }
  0x47   :  { %279 = vmatpush.msra.mxu3 %v243_v15  ;;  %316 = vmatpush.msrb.mxu0 %v297_v23 }
  0x48   :  { %364 = vmatpush.msrb.mxu1 %v297_v23 }
  0x49   :  { %317 = vmatpush.msrb.mxu0 %v296_v24 }
  0x4a   :  { %365 = vmatpush.msrb.mxu1 %v296_v24 }
  0x4b   :  { %318 = vmatpush.msrb.mxu0 %v295_v26 }
  0x4c   :  { %366 = vmatpush.msrb.mxu1 %v295_v26 }
  0x4d   :  { %319 = vmatpush.msrb.mxu0 %v294_v27 }
  0x4e   :  { %367 = vmatpush.msrb.mxu1 %v294_v27 }
  0x4f   :  { %320 = vmatpush.msrb.mxu0 %v293_v30 }
  0x50   :  { %368 = vmatpush.msrb.mxu1 %v293_v30 }
  0x51   :  { %321 = vmatpush.msrb.mxu0 %v292_v32 }
  0x52   :  { %369 = vmatpush.msrb.mxu1 %v292_v32 }
  0x53   :  { %322 = vmatpush.msrb.mxu0 %v291_v36 }
  0x54   :  { %370 = vmatpush.msrb.mxu1 %v291_v36 }
  0x55   :  { %323 = vmatpush.msrb.mxu0 %v290_v37 }
  0x56   :  { %371 = vmatpush.msrb.mxu1 %v290_v37 }
  0x57   :  { %324 = vmatpush.msrb.mxu0 %v289_v38 }
  0x58   :  { %372 = vmatpush.msrb.mxu1 %v289_v38 }
  0xb3   :  { %v142_v46 = vpop.f32.mrf.mxu0 }
  0xb4   :  { %v143_v47 = vadd.f32 %v381_v43, %v142_v46  ;;  %v385_v46 = vld [vmem:[%s637_s6] ss:$0 sm:$0xff] }
  0xb6   :  { %v148_v49 = vmax.f32 %v143_v47, 0.0 }
  0xb8   :  { %186 = vmatmul.f32.vlgmr.msra.gmra.mxu1 %v148_v49 }
  0xbb   :  { %v145_v51 = vpop.f32.mrf.mxu0 }
  0xbc   :  { %v146_v52 = vadd.f32 %v381_v43, %v145_v51 }
  0xbe   :  { %v149_v53 = vmax.f32 %v146_v52, 0.0 }
  0xc0   :  { %189 = vmatmul.f32.gmra.mxu1 %v149_v53 }
 0x135   :  { %v187_v5 = vpop.f32.mrf.mxu1 }
 0x136   :  { %v188_v6 = vadd.f32 %v382_v2, %v187_v5 }
 0x138   :  { %v193_v8 = vmax.f32 %v188_v6, 0.0 }
 0x13a   :  { %233 = vmatmul.f32.vlgmr.msra.gmra.mxu2 %v193_v8 }
 0x13d   :  { %v190_v10 = vpop.f32.mrf.mxu1 }
 0x13e   :  { %v191_v11 = vadd.f32 %v382_v2, %v190_v10 }
 0x140   :  { %v194_v12 = vmax.f32 %v191_v11, 0.0 }
 0x142   :  { %236 = vmatmul.f32.gmra.mxu2 %v194_v12 }
 0x1bd   :  { %v234_v28 = vpop.f32.mrf.mxu2 }
 0x1be   :  { %v235_v29 = vadd.f32 %v383_v25, %v234_v28 }
 0x1c0   :  { %v240_v31 = vmax.f32 %v235_v29, 0.0 }
 0x1c2   :  { %280 = vmatmul.f32.vlgmr.msra.gmra.mxu3 %v240_v31 }
 0x1c5   :  { %v237_v33 = vpop.f32.mrf.mxu2 }
 0x1c6   :  { %v238_v34 = vadd.f32 %v383_v25, %v237_v33 }
 0x1c8   :  { %v241_v35 = vmax.f32 %v238_v34, 0.0 }
 0x1ca   :  { %283 = vmatmul.f32.gmra.mxu3 %v241_v35 }
 0x245   :  { %v281_v40 = vpop.f32.mrf.mxu3 }
 0x246   :  { %v282_v41 = vadd.f32 %v384_v39, %v281_v40 }
 0x248   :  { %v287_v42 = vmax.f32 %v282_v41, 0.0 }
 0x24a   :  { %325 = vmatmul.f32.vlgmr.msrb.gmra.mxu0 %v287_v42 }
 0x24d   :  { %v284_v43 = vpop.f32.mrf.mxu3 }
 0x24e   :  { %v285_v44 = vadd.f32 %v384_v39, %v284_v43 }
 0x250   :  { %v288_v45 = vmax.f32 %v285_v44, 0.0 }
 0x252   :  { %328 = vmatmul.f32.vlgmr.msrb.gmra.mxu1 %v288_v45 }
 0x2c7   :  { %v326_v47 = vpop.f32.mrf.mxu0 }
 0x2c8   :  { %v327_v48 = vadd.f32 %v385_v46, %v326_v47 }
 0x2ca   :  { %332 = vst [vmem:[#allocation11] sm:$0xff] %v327_v48 }
 0x2cf   :  { %v329_v49 = vpop.f32.mrf.mxu1 }
 0x2d0   :  { %v330_v50 = vadd.f32 %v385_v46, %v329_v49 }
 0x2d2   :  { %333 = vst [vmem:[#allocation11 + $0x8] sm:$0xff] %v330_v50 }
 0x2d3   :  { %346 = dma.vmem_to_hbm [thread:$0]  %s339_s11, 256, %s341_s4, [#allocation4], %s539_s9, %s539_s9, %s540_s10  }
 0x2d4   :  { %536 = dma.done.wait [#allocation4], 256  }
 0x2d5   :  { %537 = vsyncadd [#allocation4], 4294967040 }
 0x2d6   :  { %351 = vsyncpa [#allocation3], 1 }
 0x2d7   :  { %352 = vsyncpa [#allocation6], 1 }
 0x2d8   :  { %353 = vsyncpa [#allocation9], 1 }
 0x2d9   :  { %354 = vsyncpa [#allocation4], 1 }

</bundles_post_ra>
